<compile_context>
chip_gen: v7x
topology: tpu7x:2x2x1
jax: 0.10.0
libtpu: 0.0.40
codegen_flags: <defaults>
</compile_context>

<pallas_src>
import functools

import numpy as np
import jax
import jax.numpy as jnp
from jax.experimental import pallas as pl
from jax.experimental.pallas import tpu as pltpu


def uafm_kernel(x_ref, yup_ref, wxt_ref, sx_ref, bx_ref, wot_ref, so_ref, bo_ref,
                mask_ref, out_ref, xs_ref, fs_ref, p1_ref, p2_ref, *, W, pad):
    Cx = x_ref.shape[1]
    Cy = yup_ref.shape[1]
    HW = x_ref.shape[2]

    masks = mask_ref[...]
    mask_l = masks[0:1, :]       # zero where (j % W) == 0      (left edge)
    mask_r = masks[1:2, :]       # zero where (j % W) == W - 1  (right edge)

    def conv3x3(src_ref, p_ref, cin, wt_ref, scale_ref, bias_ref):
        # src_ref holds the feature map in lanes [pad, pad + HW); the border
        # lanes are zero and act as the SAME-conv zero padding in the flat
        # (lane-shifted) im2col below.  Row wrap-around across W boundaries is
        # killed by the precomputed column masks.
        src = src_ref[...]                                   # (cin, 2*pad + HW)
        for dh in range(3):
            for dw in range(3):
                s = (dh - 1) * W + (dw - 1)
                patch = src[:, pad + s: pad + s + HW]        # (cin, HW)
                if dw == 0:
                    patch = patch * mask_l
                elif dw == 2:
                    patch = patch * mask_r
                t = dh * 3 + dw
                p_ref[t * cin:(t + 1) * cin, :] = patch
        acc = jnp.dot(wt_ref[...], p_ref[...],
                      preferred_element_type=jnp.float32)    # (cout, HW)
        return jnp.maximum(acc * scale_ref[...] + bias_ref[...], 0.0)

    # ---- conv_x: 3x3 conv (SAME, no bias) + folded BN + ReLU ----
    zx = jnp.zeros((Cx, pad), jnp.float32)
    xs_ref[:, 0:pad] = zx                                    # zero halo (borders only)
    xs_ref[:, pad + HW:2 * pad + HW] = zx
    xs_ref[:, pad:pad + HW] = x_ref[0]
    xconv = conv3x3(xs_ref, p1_ref, Cx, wxt_ref, sx_ref, bx_ref)    # (Cy, HW)

    # ---- fuse with the (already bilinearly upsampled) high-level feature ----
    zy = jnp.zeros((Cy, pad), jnp.float32)
    fs_ref[:, 0:pad] = zy
    fs_ref[:, pad + HW:2 * pad + HW] = zy
    fs_ref[:, pad:pad + HW] = xconv + yup_ref[0]

    # ---- conv_out: 3x3 conv + folded BN + ReLU ----
    out_ref[0] = conv3x3(fs_ref, p2_ref, Cy, wot_ref, so_ref, bo_ref)  # (Cout, HW)


def uafm_forward(x_nchw, y_nchw, params):
    """x_nchw: (B, x_ch, H, W) low-level feature; y_nchw: (B, y_ch, Hy, Wy) high-level."""
    x = x_nchw.astype(jnp.float32)
    y = y_nchw.astype(jnp.float32)
    B, Cx, H, W = x.shape
    _, Cy, Hy, Wy = y.shape
    Cout = params["wot"].shape[0]
    HW = H * W
    pad = ((W + 2 + 127) // 128) * 128      # zero-halo width (>= W+1, 128-aligned)

    # Separable bilinear resize of y to (H, W) -- same math as F.interpolate
    # (bilinear, align_corners=False); replaces the old dense kron(Wh, Ww) matmul.
    yup = jnp.einsum("hk,bckl->bchl", params["wh"], y)
    yup = jnp.einsum("wl,bchl->bchw", params["ww"], yup)
    yup_flat = yup.reshape(B, Cy, HW)
    x_flat = x.reshape(B, Cx, HW)           # contiguous reshape, no data movement

    # Column-boundary masks for the flat im2col taps (kill W wrap-around).
    col = np.arange(HW) % W
    masks = jnp.asarray(np.stack([(col != 0), (col != W - 1)]).astype(np.float32))

    kernel = functools.partial(uafm_kernel, W=W, pad=pad)

    out_flat = pl.pallas_call(
        kernel,
        out_shape=jax.ShapeDtypeStruct((B, Cout, HW), jnp.float32),
        grid_spec=pltpu.PrefetchScalarGridSpec(
            num_scalar_prefetch=0,
            grid=(B,),
            in_specs=[
                pl.BlockSpec((1, Cx, HW), lambda b: (b, 0, 0)),     # x (flat NCHW)
                pl.BlockSpec((1, Cy, HW), lambda b: (b, 0, 0)),     # upsampled y
                pl.BlockSpec((Cy, 9 * Cx), lambda b: (0, 0)),       # conv_x weights
                pl.BlockSpec((Cy, 1), lambda b: (0, 0)),            # BN scale
                pl.BlockSpec((Cy, 1), lambda b: (0, 0)),            # BN bias
                pl.BlockSpec((Cout, 9 * Cy), lambda b: (0, 0)),     # conv_out weights
                pl.BlockSpec((Cout, 1), lambda b: (0, 0)),
                pl.BlockSpec((Cout, 1), lambda b: (0, 0)),
                pl.BlockSpec((2, HW), lambda b: (0, 0)),            # column masks
            ],
            out_specs=pl.BlockSpec((1, Cout, HW), lambda b: (b, 0, 0)),
            scratch_shapes=[
                pltpu.VMEM((Cx, 2 * pad + HW), jnp.float32),        # x + zero halo
                pltpu.VMEM((Cy, 2 * pad + HW), jnp.float32),        # fused + zero halo
                pltpu.VMEM((9 * Cx, HW), jnp.float32),              # im2col patches 1
                pltpu.VMEM((9 * Cy, HW), jnp.float32),              # im2col patches 2
            ],
        ),
        compiler_params=pltpu.CompilerParams(
            dimension_semantics=("parallel",),
            vmem_limit_bytes=32 * 1024 * 1024,
        ),
    )(x_flat, yup_flat, params["wxt"], params["sx"], params["bx"],
      params["wot"], params["so"], params["bo"], masks)

    return out_flat.reshape(B, Cout, H, W)


# ----------------------- parameter / resize-matrix setup (glue) -----------------------

def _interp_matrix(out_size, in_size):
    """PyTorch F.interpolate(mode='bilinear', align_corners=False) as a matrix."""
    m = np.zeros((out_size, in_size), np.float32)
    if in_size == 1:
        m[:, 0] = 1.0
        return m
    scale = in_size / out_size
    for i in range(out_size):
        src = (i + 0.5) * scale - 0.5
        src = max(src, 0.0)
        i0 = min(int(np.floor(src)), in_size - 1)
        frac = src - i0
        i1 = min(i0 + 1, in_size - 1)
        m[i, i0] += 1.0 - frac
        m[i, i1] += frac
    return m


def _fold_bn(c, eps=1e-5):
    gamma = 1.0 + 0.1 * np.arange(c, dtype=np.float32)
    beta = 0.01 * np.arange(c, dtype=np.float32)
    mean = 0.05 * np.arange(c, dtype=np.float32)
    var = 1.0 + 0.02 * np.arange(c, dtype=np.float32)
    scale = gamma / np.sqrt(var + eps)
    bias = beta - mean * scale
    return jnp.asarray(scale)[:, None], jnp.asarray(bias)[:, None]   # (C, 1)


def init_params(key, x_ch, y_ch, out_ch, H, W, Hy, Wy):
    k1, k2 = jax.random.split(key, 2)
    wx = jax.random.normal(k1, (3, 3, x_ch, y_ch), jnp.float32) * 0.1   # HWIO
    wo = jax.random.normal(k2, (3, 3, y_ch, out_ch), jnp.float32) * 0.1
    sx, bx = _fold_bn(y_ch)
    so, bo = _fold_bn(out_ch)
    wh = jnp.asarray(_interp_matrix(H, Hy))       # (H, Hy)
    ww = jnp.asarray(_interp_matrix(W, Wy))       # (W, Wy)
    # weights rearranged for the in-kernel im2col dot: (Cout, 9*Cin), tap-major.
    wxt = jnp.transpose(wx.reshape(9, x_ch, y_ch), (2, 0, 1)).reshape(y_ch, 9 * x_ch)
    wot = jnp.transpose(wo.reshape(9, y_ch, out_ch), (2, 0, 1)).reshape(out_ch, 9 * y_ch)
    return dict(wx=wx, wo=wo, wxt=wxt, wot=wot,
                sx=sx, bx=bx, so=so, bo=bo, wh=wh, ww=ww)


# ----------------------------- pure-JAX reference ------------------------------------

def reference(x, y, p):
    yup = jnp.einsum("hk,bckl->bchl", p["wh"], y)
    yup = jnp.einsum("wl,bchl->bchw", p["ww"], yup)
    cx = jax.lax.conv_general_dilated(x, p["wx"], (1, 1), "SAME",
                                      dimension_numbers=("NCHW", "HWIO", "NCHW"))
    xb = jnp.maximum(cx * p["sx"].reshape(1, -1, 1, 1) + p["bx"].reshape(1, -1, 1, 1), 0.0)
    fused = xb + yup
    co = jax.lax.conv_general_dilated(fused, p["wo"], (1, 1), "SAME",
                                      dimension_numbers=("NCHW", "HWIO", "NCHW"))
    return jnp.maximum(co * p["so"].reshape(1, -1, 1, 1) + p["bo"].reshape(1, -1, 1, 1), 0.0)


if __name__ == "__main__":
    B, x_ch, y_ch, out_ch = 2, 4, 8, 8
    H, W = 16, 16           # low-level (x) spatial size
    Hy, Wy = 8, 8           # high-level (y) spatial size (upsampled to 16x16)

    key = jax.random.PRNGKey(0)
    kx, ky, kp = jax.random.split(key, 3)
    x = jax.random.normal(kx, (B, x_ch, H, W), jnp.float32)
    y = jax.random.normal(ky, (B, y_ch, Hy, Wy), jnp.float32)
    params = init_params(kp, x_ch, y_ch, out_ch, H, W, Hy, Wy)

    out = uafm_forward(x, y, params)
    out = jax.block_until_ready(out)

    ref = reference(x, y, params)
    assert out.shape == (B, out_ch, H, W), out.shape
    if not np.allclose(np.asarray(out), np.asarray(ref), atol=1e-3, rtol=1e-3):
        raise AssertionError("Pallas UAFM output mismatch vs JAX reference")
    print("KERNEL_OK")
</pallas_src>

<mosaic_0001>
module attributes {stable_mosaic.version = 11 : i64} {
  func.func @uafm_kernel(%arg0: i32, %arg1: memref<1x4x256xf32, #tpu.memory_space<vmem>>, %arg2: memref<1x8x256xf32, #tpu.memory_space<vmem>>, %arg3: memref<8x36xf32, #tpu.memory_space<vmem>>, %arg4: memref<8x1xf32, #tpu.memory_space<vmem>>, %arg5: memref<8x1xf32, #tpu.memory_space<vmem>>, %arg6: memref<8x72xf32, #tpu.memory_space<vmem>>, %arg7: memref<8x1xf32, #tpu.memory_space<vmem>>, %arg8: memref<8x1xf32, #tpu.memory_space<vmem>>, %arg9: memref<2x256xf32, #tpu.memory_space<vmem>>, %arg10: memref<1x8x256xf32, #tpu.memory_space<vmem>>, %arg11: memref<4x512xf32, #tpu.memory_space<vmem>>, %arg12: memref<8x512xf32, #tpu.memory_space<vmem>>, %arg13: memref<36x256xf32, #tpu.memory_space<vmem>>, %arg14: memref<72x256xf32, #tpu.memory_space<vmem>>) attributes {dimension_semantics = [#tpu.dimension_semantics<parallel>], iteration_bounds = array<i64: 2>, scalar_prefetch = 0 : i64, scratch_operands = 4 : i64, tpu.core_type = #tpu.core_type<tc>, window_params = [{transform_indices = @transform_0, window_bounds = array<i64: 1, 4, 256>}, {transform_indices = @transform_1, window_bounds = array<i64: 1, 8, 256>}, {pipeline_mode = #tpu.pipeline_mode<synchronous>, transform_indices = @transform_2, window_bounds = array<i64: 8, 36>}, {pipeline_mode = #tpu.pipeline_mode<synchronous>, transform_indices = @transform_3, window_bounds = array<i64: 8, 1>}, {pipeline_mode = #tpu.pipeline_mode<synchronous>, transform_indices = @transform_4, window_bounds = array<i64: 8, 1>}, {pipeline_mode = #tpu.pipeline_mode<synchronous>, transform_indices = @transform_5, window_bounds = array<i64: 8, 72>}, {pipeline_mode = #tpu.pipeline_mode<synchronous>, transform_indices = @transform_6, window_bounds = array<i64: 8, 1>}, {pipeline_mode = #tpu.pipeline_mode<synchronous>, transform_indices = @transform_7, window_bounds = array<i64: 8, 1>}, {pipeline_mode = #tpu.pipeline_mode<synchronous>, transform_indices = @transform_8, window_bounds = array<i64: 2, 256>}, {transform_indices = @transform_9, window_bounds = array<i64: 1, 8, 256>}]} {
    %c0 = arith.constant 0 : index
    %c0_0 = arith.constant 0 : index
    %0 = vector.load %arg9[%c0, %c0_0] : memref<2x256xf32, #tpu.memory_space<vmem>>, vector<2x256xf32>
    %1 = vector.extract_strided_slice %0 {offsets = [0, 0], sizes = [1, 256], strides = [1, 1]} : vector<2x256xf32> to vector<1x256xf32>
    %2 = vector.extract_strided_slice %0 {offsets = [1, 0], sizes = [1, 256], strides = [1, 1]} : vector<2x256xf32> to vector<1x256xf32>
    %cst = arith.constant 0.000000e+00 : f32
    %3 = vector.broadcast %cst : f32 to vector<4x128xf32>
    %c0_1 = arith.constant 0 : index
    %c0_2 = arith.constant 0 : index
    %4 = vector.load %arg11[%c0_1, %c0_2] : memref<4x512xf32, #tpu.memory_space<vmem>>, vector<4x128xf32>
    tpu.vector_store %arg11[%c0_1, %c0_2], %3 {strides = array<i32>} : memref<4x512xf32, #tpu.memory_space<vmem>>, vector<4x128xf32>,
    %c0_3 = arith.constant 0 : index
    %c384 = arith.constant 384 : index
    %5 = vector.load %arg11[%c0_3, %c384] : memref<4x512xf32, #tpu.memory_space<vmem>>, vector<4x128xf32>
    tpu.vector_store %arg11[%c0_3, %c384], %3 {strides = array<i32>} : memref<4x512xf32, #tpu.memory_space<vmem>>, vector<4x128xf32>,
    %c0_4 = arith.constant 0 : index
    %c0_5 = arith.constant 0 : index
    %c0_6 = arith.constant 0 : index
    %6 = vector.load %arg1[%c0_4, %c0_5, %c0_6] : memref<1x4x256xf32, #tpu.memory_space<vmem>>, vector<1x4x256xf32>
    %7 = vector.shape_cast %6 : vector<1x4x256xf32> to vector<4x256xf32>
    %c0_7 = arith.constant 0 : index
    %c128 = arith.constant 128 : index
    %8 = vector.load %arg11[%c0_7, %c128] : memref<4x512xf32, #tpu.memory_space<vmem>>, vector<4x256xf32>
    tpu.vector_store %arg11[%c0_7, %c128], %7 {strides = array<i32>} : memref<4x512xf32, #tpu.memory_space<vmem>>, vector<4x256xf32>,
    %c0_8 = arith.constant 0 : index
    %c0_9 = arith.constant 0 : index
    %9 = vector.load %arg11[%c0_8, %c0_9] : memref<4x512xf32, #tpu.memory_space<vmem>>, vector<4x512xf32>
    %10 = vector.extract_strided_slice %9 {offsets = [0, 111], sizes = [4, 256], strides = [1, 1]} : vector<4x512xf32> to vector<4x256xf32>
    %11 = vector.broadcast %1 : vector<1x256xf32> to vector<4x256xf32>
    %12 = arith.mulf %10, %11 : vector<4x256xf32>
    %c0_10 = arith.constant 0 : index
    %c0_11 = arith.constant 0 : index
    %13 = vector.load %arg13[%c0_10, %c0_11] : memref<36x256xf32, #tpu.memory_space<vmem>>, vector<4x256xf32>
    tpu.vector_store %arg13[%c0_10, %c0_11], %12 {strides = array<i32>} : memref<36x256xf32, #tpu.memory_space<vmem>>, vector<4x256xf32>,
    %14 = vector.extract_strided_slice %9 {offsets = [0, 112], sizes = [4, 256], strides = [1, 1]} : vector<4x512xf32> to vector<4x256xf32>
    %c4 = arith.constant 4 : index
    %c0_12 = arith.constant 0 : index
    %15 = vector.load %arg13[%c4, %c0_12] : memref<36x256xf32, #tpu.memory_space<vmem>>, vector<4x256xf32>
    tpu.vector_store %arg13[%c4, %c0_12], %14 {strides = array<i32>} : memref<36x256xf32, #tpu.memory_space<vmem>>, vector<4x256xf32>,
    %16 = vector.extract_strided_slice %9 {offsets = [0, 113], sizes = [4, 256], strides = [1, 1]} : vector<4x512xf32> to vector<4x256xf32>
    %17 = vector.broadcast %2 : vector<1x256xf32> to vector<4x256xf32>
    %18 = arith.mulf %16, %17 : vector<4x256xf32>
    %c8 = arith.constant 8 : index
    %c0_13 = arith.constant 0 : index
    %19 = vector.load %arg13[%c8, %c0_13] : memref<36x256xf32, #tpu.memory_space<vmem>>, vector<4x256xf32>
    tpu.vector_store %arg13[%c8, %c0_13], %18 {strides = array<i32>} : memref<36x256xf32, #tpu.memory_space<vmem>>, vector<4x256xf32>,
    %20 = vector.extract_strided_slice %9 {offsets = [0, 127], sizes = [4, 256], strides = [1, 1]} : vector<4x512xf32> to vector<4x256xf32>
    %21 = vector.broadcast %1 : vector<1x256xf32> to vector<4x256xf32>
    %22 = arith.mulf %20, %21 : vector<4x256xf32>
    %c12 = arith.constant 12 : index
    %c0_14 = arith.constant 0 : index
    %23 = vector.load %arg13[%c12, %c0_14] : memref<36x256xf32, #tpu.memory_space<vmem>>, vector<4x256xf32>
    tpu.vector_store %arg13[%c12, %c0_14], %22 {strides = array<i32>} : memref<36x256xf32, #tpu.memory_space<vmem>>, vector<4x256xf32>,
    %24 = vector.extract_strided_slice %9 {offsets = [0, 128], sizes = [4, 256], strides = [1, 1]} : vector<4x512xf32> to vector<4x256xf32>
    %c16 = arith.constant 16 : index
    %c0_15 = arith.constant 0 : index
    %25 = vector.load %arg13[%c16, %c0_15] : memref<36x256xf32, #tpu.memory_space<vmem>>, vector<4x256xf32>
    tpu.vector_store %arg13[%c16, %c0_15], %24 {strides = array<i32>} : memref<36x256xf32, #tpu.memory_space<vmem>>, vector<4x256xf32>,
    %26 = vector.extract_strided_slice %9 {offsets = [0, 129], sizes = [4, 256], strides = [1, 1]} : vector<4x512xf32> to vector<4x256xf32>
    %27 = vector.broadcast %2 : vector<1x256xf32> to vector<4x256xf32>
    %28 = arith.mulf %26, %27 : vector<4x256xf32>
    %c20 = arith.constant 20 : index
    %c0_16 = arith.constant 0 : index
    %29 = vector.load %arg13[%c20, %c0_16] : memref<36x256xf32, #tpu.memory_space<vmem>>, vector<4x256xf32>
    tpu.vector_store %arg13[%c20, %c0_16], %28 {strides = array<i32>} : memref<36x256xf32, #tpu.memory_space<vmem>>, vector<4x256xf32>,
    %30 = vector.extract_strided_slice %9 {offsets = [0, 143], sizes = [4, 256], strides = [1, 1]} : vector<4x512xf32> to vector<4x256xf32>
    %31 = vector.broadcast %1 : vector<1x256xf32> to vector<4x256xf32>
    %32 = arith.mulf %30, %31 : vector<4x256xf32>
    %c24 = arith.constant 24 : index
    %c0_17 = arith.constant 0 : index
    %33 = vector.load %arg13[%c24, %c0_17] : memref<36x256xf32, #tpu.memory_space<vmem>>, vector<4x256xf32>
    tpu.vector_store %arg13[%c24, %c0_17], %32 {strides = array<i32>} : memref<36x256xf32, #tpu.memory_space<vmem>>, vector<4x256xf32>,
    %34 = vector.extract_strided_slice %9 {offsets = [0, 144], sizes = [4, 256], strides = [1, 1]} : vector<4x512xf32> to vector<4x256xf32>
    %c28 = arith.constant 28 : index
    %c0_18 = arith.constant 0 : index
    %35 = vector.load %arg13[%c28, %c0_18] : memref<36x256xf32, #tpu.memory_space<vmem>>, vector<4x256xf32>
    tpu.vector_store %arg13[%c28, %c0_18], %34 {strides = array<i32>} : memref<36x256xf32, #tpu.memory_space<vmem>>, vector<4x256xf32>,
    %36 = vector.extract_strided_slice %9 {offsets = [0, 145], sizes = [4, 256], strides = [1, 1]} : vector<4x512xf32> to vector<4x256xf32>
    %37 = vector.broadcast %2 : vector<1x256xf32> to vector<4x256xf32>
    %38 = arith.mulf %36, %37 : vector<4x256xf32>
    %c32 = arith.constant 32 : index
    %c0_19 = arith.constant 0 : index
    %39 = vector.load %arg13[%c32, %c0_19] : memref<36x256xf32, #tpu.memory_space<vmem>>, vector<4x256xf32>
    tpu.vector_store %arg13[%c32, %c0_19], %38 {strides = array<i32>} : memref<36x256xf32, #tpu.memory_space<vmem>>, vector<4x256xf32>,
    %c0_20 = arith.constant 0 : index
    %c0_21 = arith.constant 0 : index
    %40 = vector.load %arg3[%c0_20, %c0_21] : memref<8x36xf32, #tpu.memory_space<vmem>>, vector<8x36xf32>
    %c0_22 = arith.constant 0 : index
    %c0_23 = arith.constant 0 : index
    %41 = vector.load %arg13[%c0_22, %c0_23] : memref<36x256xf32, #tpu.memory_space<vmem>>, vector<36x256xf32>
    %cst_24 = arith.constant dense<0.000000e+00> : vector<8x256xf32>
    %42 = tpu.matmul %40, %41, %cst_24 {dimension_numbers = #tpu.dot_dimension_numbers<[1], [0], [0], [1], [0, 0, 1, 1], [], []>} : vector<8x36xf32>, vector<36x256xf32>, vector<8x256xf32> -> vector<8x256xf32>
    %c0_25 = arith.constant 0 : index
    %c0_26 = arith.constant 0 : index
    %43 = vector.load %arg4[%c0_25, %c0_26] : memref<8x1xf32, #tpu.memory_space<vmem>>, vector<8x1xf32>
    %44 = vector.broadcast %43 : vector<8x1xf32> to vector<8x256xf32>
    %45 = arith.mulf %42, %44 : vector<8x256xf32>
    %c0_27 = arith.constant 0 : index
    %c0_28 = arith.constant 0 : index
    %46 = vector.load %arg5[%c0_27, %c0_28] : memref<8x1xf32, #tpu.memory_space<vmem>>, vector<8x1xf32>
    %47 = vector.broadcast %46 : vector<8x1xf32> to vector<8x256xf32>
    %48 = arith.addf %45, %47 : vector<8x256xf32>
    %cst_29 = arith.constant 0.000000e+00 : f32
    %49 = vector.broadcast %cst_29 : f32 to vector<8x256xf32>
    %50 = arith.maximumf %48, %49 : vector<8x256xf32>
    %cst_30 = arith.constant 0.000000e+00 : f32
    %51 = vector.broadcast %cst_30 : f32 to vector<8x128xf32>
    %c0_31 = arith.constant 0 : index
    %c0_32 = arith.constant 0 : index
    %52 = vector.load %arg12[%c0_31, %c0_32] : memref<8x512xf32, #tpu.memory_space<vmem>>, vector<8x128xf32>
    tpu.vector_store %arg12[%c0_31, %c0_32], %51 {strides = array<i32>} : memref<8x512xf32, #tpu.memory_space<vmem>>, vector<8x128xf32>,
    %c0_33 = arith.constant 0 : index
    %c384_34 = arith.constant 384 : index
    %53 = vector.load %arg12[%c0_33, %c384_34] : memref<8x512xf32, #tpu.memory_space<vmem>>, vector<8x128xf32>
    tpu.vector_store %arg12[%c0_33, %c384_34], %51 {strides = array<i32>} : memref<8x512xf32, #tpu.memory_space<vmem>>, vector<8x128xf32>,
    %c0_35 = arith.constant 0 : index
    %c0_36 = arith.constant 0 : index
    %c0_37 = arith.constant 0 : index
    %54 = vector.load %arg2[%c0_35, %c0_36, %c0_37] : memref<1x8x256xf32, #tpu.memory_space<vmem>>, vector<1x8x256xf32>
    %55 = vector.shape_cast %54 : vector<1x8x256xf32> to vector<8x256xf32>
    %56 = arith.addf %50, %55 : vector<8x256xf32>
    %c0_38 = arith.constant 0 : index
    %c128_39 = arith.constant 128 : index
    %57 = vector.load %arg12[%c0_38, %c128_39] : memref<8x512xf32, #tpu.memory_space<vmem>>, vector<8x256xf32>
    tpu.vector_store %arg12[%c0_38, %c128_39], %56 {strides = array<i32>} : memref<8x512xf32, #tpu.memory_space<vmem>>, vector<8x256xf32>,
    %c0_40 = arith.constant 0 : index
    %c0_41 = arith.constant 0 : index
    %58 = vector.load %arg12[%c0_40, %c0_41] : memref<8x512xf32, #tpu.memory_space<vmem>>, vector<8x512xf32>
    %59 = vector.extract_strided_slice %58 {offsets = [0, 111], sizes = [8, 256], strides = [1, 1]} : vector<8x512xf32> to vector<8x256xf32>
    %60 = vector.broadcast %1 : vector<1x256xf32> to vector<8x256xf32>
    %61 = arith.mulf %59, %60 : vector<8x256xf32>
    %c0_42 = arith.constant 0 : index
    %c0_43 = arith.constant 0 : index
    %62 = vector.load %arg14[%c0_42, %c0_43] : memref<72x256xf32, #tpu.memory_space<vmem>>, vector<8x256xf32>
    tpu.vector_store %arg14[%c0_42, %c0_43], %61 {strides = array<i32>} : memref<72x256xf32, #tpu.memory_space<vmem>>, vector<8x256xf32>,
    %63 = vector.extract_strided_slice %58 {offsets = [0, 112], sizes = [8, 256], strides = [1, 1]} : vector<8x512xf32> to vector<8x256xf32>
    %c8_44 = arith.constant 8 : index
    %c0_45 = arith.constant 0 : index
    %64 = vector.load %arg14[%c8_44, %c0_45] : memref<72x256xf32, #tpu.memory_space<vmem>>, vector<8x256xf32>
    tpu.vector_store %arg14[%c8_44, %c0_45], %63 {strides = array<i32>} : memref<72x256xf32, #tpu.memory_space<vmem>>, vector<8x256xf32>,
    %65 = vector.extract_strided_slice %58 {offsets = [0, 113], sizes = [8, 256], strides = [1, 1]} : vector<8x512xf32> to vector<8x256xf32>
    %66 = vector.broadcast %2 : vector<1x256xf32> to vector<8x256xf32>
    %67 = arith.mulf %65, %66 : vector<8x256xf32>
    %c16_46 = arith.constant 16 : index
    %c0_47 = arith.constant 0 : index
    %68 = vector.load %arg14[%c16_46, %c0_47] : memref<72x256xf32, #tpu.memory_space<vmem>>, vector<8x256xf32>
    tpu.vector_store %arg14[%c16_46, %c0_47], %67 {strides = array<i32>} : memref<72x256xf32, #tpu.memory_space<vmem>>, vector<8x256xf32>,
    %69 = vector.extract_strided_slice %58 {offsets = [0, 127], sizes = [8, 256], strides = [1, 1]} : vector<8x512xf32> to vector<8x256xf32>
    %70 = vector.broadcast %1 : vector<1x256xf32> to vector<8x256xf32>
    %71 = arith.mulf %69, %70 : vector<8x256xf32>
    %c24_48 = arith.constant 24 : index
    %c0_49 = arith.constant 0 : index
    %72 = vector.load %arg14[%c24_48, %c0_49] : memref<72x256xf32, #tpu.memory_space<vmem>>, vector<8x256xf32>
    tpu.vector_store %arg14[%c24_48, %c0_49], %71 {strides = array<i32>} : memref<72x256xf32, #tpu.memory_space<vmem>>, vector<8x256xf32>,
    %73 = vector.extract_strided_slice %58 {offsets = [0, 128], sizes = [8, 256], strides = [1, 1]} : vector<8x512xf32> to vector<8x256xf32>
    %c32_50 = arith.constant 32 : index
    %c0_51 = arith.constant 0 : index
    %74 = vector.load %arg14[%c32_50, %c0_51] : memref<72x256xf32, #tpu.memory_space<vmem>>, vector<8x256xf32>
    tpu.vector_store %arg14[%c32_50, %c0_51], %73 {strides = array<i32>} : memref<72x256xf32, #tpu.memory_space<vmem>>, vector<8x256xf32>,
    %75 = vector.extract_strided_slice %58 {offsets = [0, 129], sizes = [8, 256], strides = [1, 1]} : vector<8x512xf32> to vector<8x256xf32>
    %76 = vector.broadcast %2 : vector<1x256xf32> to vector<8x256xf32>
    %77 = arith.mulf %75, %76 : vector<8x256xf32>
    %c40 = arith.constant 40 : index
    %c0_52 = arith.constant 0 : index
    %78 = vector.load %arg14[%c40, %c0_52] : memref<72x256xf32, #tpu.memory_space<vmem>>, vector<8x256xf32>
    tpu.vector_store %arg14[%c40, %c0_52], %77 {strides = array<i32>} : memref<72x256xf32, #tpu.memory_space<vmem>>, vector<8x256xf32>,
    %79 = vector.extract_strided_slice %58 {offsets = [0, 143], sizes = [8, 256], strides = [1, 1]} : vector<8x512xf32> to vector<8x256xf32>
    %80 = vector.broadcast %1 : vector<1x256xf32> to vector<8x256xf32>
    %81 = arith.mulf %79, %80 : vector<8x256xf32>
    %c48 = arith.constant 48 : index
    %c0_53 = arith.constant 0 : index
    %82 = vector.load %arg14[%c48, %c0_53] : memref<72x256xf32, #tpu.memory_space<vmem>>, vector<8x256xf32>
    tpu.vector_store %arg14[%c48, %c0_53], %81 {strides = array<i32>} : memref<72x256xf32, #tpu.memory_space<vmem>>, vector<8x256xf32>,
    %83 = vector.extract_strided_slice %58 {offsets = [0, 144], sizes = [8, 256], strides = [1, 1]} : vector<8x512xf32> to vector<8x256xf32>
    %c56 = arith.constant 56 : index
    %c0_54 = arith.constant 0 : index
    %84 = vector.load %arg14[%c56, %c0_54] : memref<72x256xf32, #tpu.memory_space<vmem>>, vector<8x256xf32>
    tpu.vector_store %arg14[%c56, %c0_54], %83 {strides = array<i32>} : memref<72x256xf32, #tpu.memory_space<vmem>>, vector<8x256xf32>,
    %85 = vector.extract_strided_slice %58 {offsets = [0, 145], sizes = [8, 256], strides = [1, 1]} : vector<8x512xf32> to vector<8x256xf32>
    %86 = vector.broadcast %2 : vector<1x256xf32> to vector<8x256xf32>
    %87 = arith.mulf %85, %86 : vector<8x256xf32>
    %c64 = arith.constant 64 : index
    %c0_55 = arith.constant 0 : index
    %88 = vector.load %arg14[%c64, %c0_55] : memref<72x256xf32, #tpu.memory_space<vmem>>, vector<8x256xf32>
    tpu.vector_store %arg14[%c64, %c0_55], %87 {strides = array<i32>} : memref<72x256xf32, #tpu.memory_space<vmem>>, vector<8x256xf32>,
    %c0_56 = arith.constant 0 : index
    %c0_57 = arith.constant 0 : index
    %89 = vector.load %arg6[%c0_56, %c0_57] : memref<8x72xf32, #tpu.memory_space<vmem>>, vector<8x72xf32>
    %c0_58 = arith.constant 0 : index
    %c0_59 = arith.constant 0 : index
    %90 = vector.load %arg14[%c0_58, %c0_59] : memref<72x256xf32, #tpu.memory_space<vmem>>, vector<72x256xf32>
    %cst_60 = arith.constant dense<0.000000e+00> : vector<8x256xf32>
    %91 = tpu.matmul %89, %90, %cst_60 {dimension_numbers = #tpu.dot_dimension_numbers<[1], [0], [0], [1], [0, 0, 1, 1], [], []>} : vector<8x72xf32>, vector<72x256xf32>, vector<8x256xf32> -> vector<8x256xf32>
    %c0_61 = arith.constant 0 : index
    %c0_62 = arith.constant 0 : index
    %92 = vector.load %arg7[%c0_61, %c0_62] : memref<8x1xf32, #tpu.memory_space<vmem>>, vector<8x1xf32>
    %93 = vector.broadcast %92 : vector<8x1xf32> to vector<8x256xf32>
    %94 = arith.mulf %91, %93 : vector<8x256xf32>
    %c0_63 = arith.constant 0 : index
    %c0_64 = arith.constant 0 : index
    %95 = vector.load %arg8[%c0_63, %c0_64] : memref<8x1xf32, #tpu.memory_space<vmem>>, vector<8x1xf32>
    %96 = vector.broadcast %95 : vector<8x1xf32> to vector<8x256xf32>
    %97 = arith.addf %94, %96 : vector<8x256xf32>
    %cst_65 = arith.constant 0.000000e+00 : f32
    %98 = vector.broadcast %cst_65 : f32 to vector<8x256xf32>
    %99 = arith.maximumf %97, %98 : vector<8x256xf32>
    %c0_66 = arith.constant 0 : index
    %c0_67 = arith.constant 0 : index
    %c0_68 = arith.constant 0 : index
    %100 = vector.load %arg10[%c0_66, %c0_67, %c0_68] : memref<1x8x256xf32, #tpu.memory_space<vmem>>, vector<1x8x256xf32>
    %101 = vector.shape_cast %100 : vector<1x8x256xf32> to vector<8x256xf32>
    %102 = vector.shape_cast %99 : vector<8x256xf32> to vector<1x8x256xf32>
    tpu.vector_store %arg10[%c0_66, %c0_67, %c0_68], %102 {strides = array<i32>} : memref<1x8x256xf32, #tpu.memory_space<vmem>>, vector<1x8x256xf32>,
    return
  }
  func.func @transform_0(%arg0: i32) -> (i32, i32, i32) {
    %c0_i32 = arith.constant 0 : i32
    %c0_i32_0 = arith.constant 0 : i32
    %c0_i32_1 = arith.constant 0 : i32
    return %arg0, %c0_i32, %c0_i32_0 : i32, i32, i32
  }
  func.func @transform_1(%arg0: i32) -> (i32, i32, i32) {
    %c0_i32 = arith.constant 0 : i32
    %c0_i32_0 = arith.constant 0 : i32
    %c0_i32_1 = arith.constant 0 : i32
    return %arg0, %c0_i32, %c0_i32_0 : i32, i32, i32
  }
  func.func @transform_2(%arg0: i32) -> (i32, i32) {
    %c0_i32 = arith.constant 0 : i32
    %c0_i32_0 = arith.constant 0 : i32
    %c0_i32_1 = arith.constant 0 : i32
    return %c0_i32, %c0_i32_0 : i32, i32
  }
  func.func @transform_3(%arg0: i32) -> (i32, i32) {
    %c0_i32 = arith.constant 0 : i32
    %c0_i32_0 = arith.constant 0 : i32
    %c0_i32_1 = arith.constant 0 : i32
    return %c0_i32, %c0_i32_0 : i32, i32
  }
  func.func @transform_4(%arg0: i32) -> (i32, i32) {
    %c0_i32 = arith.constant 0 : i32
    %c0_i32_0 = arith.constant 0 : i32
    %c0_i32_1 = arith.constant 0 : i32
    return %c0_i32, %c0_i32_0 : i32, i32
  }
  func.func @transform_5(%arg0: i32) -> (i32, i32) {
    %c0_i32 = arith.constant 0 : i32
    %c0_i32_0 = arith.constant 0 : i32
    %c0_i32_1 = arith.constant 0 : i32
    return %c0_i32, %c0_i32_0 : i32, i32
  }
  func.func @transform_6(%arg0: i32) -> (i32, i32) {
    %c0_i32 = arith.constant 0 : i32
    %c0_i32_0 = arith.constant 0 : i32
    %c0_i32_1 = arith.constant 0 : i32
    return %c0_i32, %c0_i32_0 : i32, i32
  }
  func.func @transform_7(%arg0: i32) -> (i32, i32) {
    %c0_i32 = arith.constant 0 : i32
    %c0_i32_0 = arith.constant 0 : i32
    %c0_i32_1 = arith.constant 0 : i32
    return %c0_i32, %c0_i32_0 : i32, i32
  }
  func.func @transform_8(%arg0: i32) -> (i32, i32) {
    %c0_i32 = arith.constant 0 : i32
    %c0_i32_0 = arith.constant 0 : i32
    %c0_i32_1 = arith.constant 0 : i32
    return %c0_i32, %c0_i32_0 : i32, i32
  }
  func.func @transform_9(%arg0: i32) -> (i32, i32, i32) {
    %c0_i32 = arith.constant 0 : i32
    %c0_i32_0 = arith.constant 0 : i32
    %c0_i32_1 = arith.constant 0 : i32
    return %arg0, %c0_i32, %c0_i32_0 : i32, i32, i32
  }
}

</mosaic_0001>

<bundles_post_ra>
// kernel: tpu_custom_call.1
= control target key start
LH: loop header
LB: loop body
LE: loop exit
PB: predicated region body
PF: predicated region fallthrough
CT: control target
= control target key end

     0   :  { %14 = vsyncpa [#allocation7], 0  ;;  %s1775_s0 = inlined_call_operand.hbm [shape: f32[2,4,256], index: 0, kind: input, shape index: {}]   ;;  %s1776_s1 = inlined_call_operand.vmem [shape: f32[2,8,256], index: 1, kind: input, shape index: {}]   ;;  %s1777_s2 = inlined_call_operand.vmem [shape: f32[8,36], index: 2, kind: input, shape index: {}]   ;;  %s1778_s3 = inlined_call_operand.vmem [shape: f32[8,1], index: 3, kind: input, shape index: {}]   ;;  %s1779_s4 = inlined_call_operand.vmem [shape: f32[8,1], index: 4, kind: input, shape index: {}]   ;;  %s1780_s5 = inlined_call_operand.vmem [shape: f32[8,72], index: 5, kind: input, shape index: {}]   ;;  %s1781_s6 = inlined_call_operand.vmem [shape: f32[8,1], index: 6, kind: input, shape index: {}]   ;;  %s1782_s7 = inlined_call_operand.vmem [shape: f32[8,1], index: 7, kind: input, shape index: {}]   ;;  %s1783_s8 = inlined_call_operand.vmem [shape: f32[2,256], index: 8, kind: input, shape index: {}]   ;;  %s1784_s9 = inlined_call_operand.hbm [shape: f32[2,8,256], index: 9, kind: output, shape index: {}]  }
   0x1   :  { %16 = vsyncpa [#allocation7 + $0x1], 0 }
   0x2   :  { %17 = vsyncpa [#allocation8], 0 }
   0x3   :  { %19 = vsyncpa [#allocation8 + $0x1], 0  ;;  %s1399_s30 = smov 0   ;;  %s1401_s10 = smov 0  }
   0x4   :  { %s1403_s11 = smov 0   ;;  %s1405_s12 = smov 0  }
   0x5 LB: > { %s1420_s13 = sadd.s32 4294967295, %s1335_s12   ;;  %s1096_s14 = sadd.s32 4294967294, %s1335_s12   ;;  %s1335_s12 = sphi %s1405_s12, %s1808_s12   ;;  %s1331_s11 = sphi %s1403_s11, %s1807_s11   ;;  %s1327_s10 = sphi %s1401_s10, %s1806_s10   ;;  %s1323_s30 = sphi %s1399_s30, %s1805_s30  }
   0x6   : > { %s1424_s15 = sadd.s32 1, %s1335_s12   ;;  %s32_s16 = sadd.s32 1, %s1331_s11 }
   0x7   : > { %s29_s17 = ssub.s32 %s1335_s12, %s1424_s15  ;;  %p39_p0 = scmp.ne.s32.totalorder %s1331_s11, %s1327_s10 }
   0x8   : > { %p30_p1 = scmp.eq.s32.totalorder %s29_s17, 0  ;;  %p40_p2 = scmp.eq.s32.totalorder %s1335_s12, 0 }
   0x9   : > { %p45_p3 = scmp.ne.s32.totalorder %s1327_s10, %s1323_s30  ;;  %p46_p4 = scmp.eq.s32.totalorder %s1420_s13, 0 }
   0xa   : > { %s1436_s18 = scalar_select %p30_p1, %s1331_s11, %s32_s16  }
   0xb   : > { %p1438_p5 = por %p40_p2, %p39_p0  ;;  %p1442_p6 = por %p46_p4, %p45_p3 }
   0xc   : > { %p242_p7 = scmp.eq.s32.totalorder %s1420_s13, 1  ;;  %p248_p8 = scmp.eq.s32.totalorder %s1096_s14, 1 }
   0xd   : > { %p1155_p10 = scmp.lt.s32.totalorder %s1335_s12, 2  ;;  %s289_s23 = sand.u32 1, %s1331_s11  }
   0xe   : > { %p1449_p11 = por %p242_p7, %p39_p0  ;;  %p1453_p12 = por %p248_p8, %p45_p3 }
   0xf   : > { %s1116_s24 = sshll.u32 %s1335_s12, 7  ;;  %s1099_s25 = sshll.u32 %s289_s23, 3 }
  0x10   : > { %s1794_s21 = scalar_select %p1449_p11, 1, 0 }
  0x11   : > { %s1795_s22 = scalar_select %p1453_p12, 1, 0 }
  0x12   : > { %s1462_s28 = scalar_lea.hbm %s1775_s0, %s1116_s24  ;;  %s293_s29 = scalar_lea.vmem [#allocation6], %s1099_s25 }
  0x13   : > { %s301_s14 = sshll.u32 %s293_s29, 4  ;;  %p1466_p13 = pnand %p1155_p10, %p1438_p5  ;;  %s1470_s14 = int_to_ptr.vmem [resolvable:$true] %s301_s14 }
  0x14   : > { %s290_s17 = scalar_lea.sflag [#allocation7], %s289_s23  ;;  %s1239_s24 = scalar_lea.hbm %s1462_s28, 128 }
  0x15   : > { %p1240_p2 = scmp.ne.s32.totalorder %s1462_s28, %s1239_s24  ;;  %p1241_p3 = pneg %p1466_p13 }
  0x16   : > { %s1244_s26 = scalar_lea.hbm %s1775_s0, 256  ;;  %p1245_p5 = scmp.lt.u32.totalorder %s1462_s28, %s1775_s0 }
  0x17   : > { %p1242_p4 = pnand %p1241_p3, %p1240_p2  ;;  %p1246_p8 = scmp.lt.u32.totalorder %s1244_s26, %s1239_s24 }
  0x18   : > { %p1248_p9 = scmp.lt.u32.totalorder %s1239_s24, %s1462_s28 }
  0x19   : > { %p1243_p7 = pneg %p1242_p4  ;;  %p1247_p10 = por %p1246_p8, %p1245_p5 }
  0x1b   : > { %p1249_p0 = por %p1248_p9, %p1247_p10 }
  0x1d   : > { %p1250_p1 = pnand %p1249_p0, %p1243_p7 }
  0x1f   : > { %1253 = shalt.err (!%p1250_p1)
}
  0x20   : > { %s1254_s23 = scalar_lea.vmem %s1470_s14, 128  ;;  %s1337_s19 = smov [#allocation6]  }
  0x21   : > { %p1255_p2 = scmp.ne.s32.totalorder %s1470_s14, %s1254_s23  ;;  %s1259_s25 = sshll.u32 %s1337_s19, 4  ;;  %s1260_s25 = int_to_ptr.vmem [resolvable:$false] %s1259_s25 }
  0x22   : > { %s1261_s27 = scalar_lea.vmem %s1260_s25, 256  ;;  %p1262_p11 = scmp.lt.s32.totalorder %s1470_s14, %s1260_s25 }
  0x23   : > { %p1257_p4 = pnand %p1255_p2, %p1241_p3  ;;  %p1263_p5 = scmp.lt.s32.totalorder %s1261_s27, %s1254_s23 }
  0x25   : > { %p1258_p12 = pneg %p1257_p4  ;;  %p1264_p8 = por %p1263_p5, %p1262_p11 }
  0x27   : > { %p1265_p9 = pnand %p1264_p8, %p1258_p12 }
  0x29   : > { %1268 = shalt.err (!%p1265_p9)
}
  0x2a   : > { %1150 = dma.hbm_to_vmem [thread:$0]  (!%p1466_p13), %s1462_s28, 128, %s1470_s14, %s290_s17  }
  0x2b   : > { %p1797_p0 = scmp.lt.s32.totalorder %s1335_s12, 3  ;;  %p1798_p1 = scmp.ge.s32.totalorder %s1335_s12, 1 }
  0x2d   : > { %p315_p3 = pnand %p1798_p1, %p1797_p0 }
  0x2e   : > { %s1504_s24 = sand.u32 (!%p315_p3), 1, %s1327_s10  }
  0x2f   : > { %318 = sbr.rel (%p315_p3) target bundleno = 942 (0x3ae), region = 56  ;;  %s1103_s26 = sshll.u32 (!%p315_p3), %s1504_s24, 3 }
  0x30   : > { %s321_s29 = scalar_lea.sflag (!%p315_p3), [#allocation7], %s1504_s24  ;;  %s324_s23 = scalar_lea.vmem (!%p315_p3), [#allocation6], %s1103_s26 }
  0x36   : > { %1314 = dma.done.wait (%p1442_p6), %s321_s29, 128  }
  0x37   : > { %1316 = vsyncadd (%p1442_p6), %s321_s29, 4294967168  ;;  %v377_v0 = vlaneseq  ;;  %v1338_v1 = vmov 0.0   ;;  %v369_v7 = vld [vmem:[%s1783_s8] sm:$0xf]  ;;  %s1339_s20 = smov 127   ;;  %s1788_s16 = smov 111  }
  0x38   : > { %371 = vst [vmem:[#allocation2 + $0xc] sm:$0xf] %v1338_v1  ;;  %370 = vst [vmem:[#allocation2] sm:$0xf] %v1338_v1  ;;  %662 = vmatprep.mubr.f32.mxu0 %v1338_v1  ;;  %972 = vmatprep.mubr.f32.mxu1 %v1338_v1  ;;  %v372_v8 = vld [vmem:[%s324_s23] sm:$0xff]  ;;  %s1341_s17 = smov 113  }
  0x39   : > { %v378_v2 = vshrl.u32 %v377_v0, 7  ;;  %373 = vst [vmem:[#allocation2 + $0x4] sm:$0xff] %v372_v8  ;;  %s1786_s19 = smov 16   ;;  %vm489_vm0 = vcmask 1039360   ;;  %vm401_vm1 = vcmask 908288   ;;  %s1343_s25 = smov 17  }
  0x3a   : > { %vm464_vm2 = vcmask 924672   ;;  %s1344_s27 = smov 1   ;;  %vm522_vm3 = vcmask 1043456   ;;  %s1345_s26 = smov 15   ;;  %vm433_vm4 = vcmask 130048   ;;  %vm505_vm5 = vcmask 7168  }
  0x3b   : > { %v379_v3 = vsub.s32 0, %v378_v2  ;;  %v383_v4 = vsub.s32 2, %v378_v2  ;;  %v442_v5 = vsub.s32 1, %v378_v2  ;;  %v446_v6 = vsub.s32 3, %v378_v2  ;;  %s1790_s29 = smov 112   ;;  %p364_p6 = scmp.lt.s32.totalorder %s1420_s13, 1 }
  0x3c   : > { %vm416_vm6 = vcmask 138240   ;;  %vm479_vm7 = vcmask 121856   ;;  %vm555_vm8 = vcmask 916480   ;;  %vm588_vm9 = vcmask 293888   ;;  %p1802_p12 = scmp.ne.s32.totalorder %s1794_s21, 0 }
  0x3d   : > { %v380_v9 = vrot.slane %v369_v7, %v379_v3  ;;  %v384_v10 = vrot.slane %v369_v7, %v383_v4  ;;  %v443_v11 = vrot.slane %v369_v7, %v442_v5  ;;  %v447_v12 = vrot.slane %v369_v7, %v446_v6  ;;  %s365_s14 = scalar_select %p364_p6, %s1420_s13, 1 }
  0x3e   : > { %vm904_vm10 = vcmask 588800  }
  0x3f   : > { %v1519_v13 = vrot.slane %v380_v9, %v379_v3  ;;  %v1521_v14 = vrot.slane %v384_v10, %v379_v3  ;;  %v1523_v15 = vrot.slane %v443_v11, %v442_v5  ;;  %v1525_v16 = vrot.slane %v447_v12, %v442_v5  ;;  %v669_v9 = vld [vmem:[%s1778_s3] sm:$0xff]  ;;  %s1117_s23 = sshll.u32 %s365_s14, 4  ;;  %s1104_s14 = sshll.u32 %s1504_s24, 4 }
  0x40   : > { %v1539_v19 = vld [vmem:[#allocation2 + $0x8] sm:$0xff]  ;;  %v1541_v20 = vld [vmem:[#allocation2] sm:$0xff]  ;;  %v1347_v11 = vmov 0   ;;  %s363_s28 = scalar_lea.vmem [#allocation9], %s1104_s14 }
  0x41   : > { %v1529_v17 = vcombine.low %v1519_v13, %v1521_v14  ;;  %v1537_v18 = vcombine.low %v1523_v15, %v1525_v16  ;;  %515 = vst [vmem:[#allocation4 + $0x28] sm:$0xf] %v1539_v19  ;;  %v1556_v21 = vcombine.low %v1539_v19, %v1539_v19  ;;  %v425_v22 = vcombine.low %v1541_v20, %v1541_v20  ;;  %v677_v10 = vld [vmem:[%s1779_s4] sm:$0xff] }
  0x42   : > { %v512_v23 = vcombine.high %v1541_v20, %v1541_v20  ;;  %1200 = vset.pattern.permute.xlu1 %v1347_v11  ;;  %1199 = vset.pattern.permute.xlu0 %v1347_v11 }
  0x43   : > { %486 = vrot.lane.b32.xlu1 %v1529_v17, %s1339_s20  ;;  %398 = vrot.lane.b32.xlu0 %v1529_v17, %s1788_s16 }
  0x44   : > { %514 = vst [vmem:[#allocation4 + $0x20] sm:$0xf] %v512_v23 }
  0x47   : > { %461 = vrot.lane.b32.xlu0 %v1537_v18, %s1341_s17  ;;  %533 = vrot.lane.b32.xlu1 %v1541_v20, %s1341_s17 }
  0x4b   : > { %535 = vrot.lane.b32.xlu0 %v1539_v19, %s1341_s17  ;;  %516 = vrot.lane.b32.xlu1 %v1541_v20, %s1339_s20 }
  0x4f   : > { %518 = vrot.lane.b32.xlu0 %v1539_v19, %s1339_s20  ;;  %429 = vrot.lane.b32.xlu1 %v1541_v20, %s1786_s19 }
  0x53   : > { %431 = vrot.lane.b32.xlu0 %v1556_v21, %s1786_s19  ;;  %562 = vrot.lane.b32.xlu1 %v1541_v20, %s1788_s16 }
  0x57   : > { %427 = vrot.lane.b32.xlu0 %v425_v22, %s1786_s19  ;;  %s1799_s19 = smov 16  }
  0x5b   : > { %564 = vrot.lane.b32.xlu0 %v1539_v19, %s1788_s16 }
  0xb5   : > { %v487_v24 = vpop.permute.xlu1 %486  ;;  %v399_v25 = vpop.permute.xlu0 %398 }
  0xb6   : > { %v488_v26 = vrot.slane %v487_v24, 4  ;;  %v400_v27 = vrot.slane %v399_v25, 4 }
  0xb8   : > { %v490_v28 = vsel %vm489_vm0, %v488_v26, %v487_v24  ;;  %v406_v29 = vmul.f32 %v400_v27, %v1539_v19  ;;  %v402_v33 = vsel %vm401_vm1, %v400_v27, %v399_v25  ;;  %v494_v35 = vmul.f32 %v488_v26, %v1539_v19 }
  0xb9   : > { %v493_v30 = vmul.f32 %v490_v28, %v1541_v20  ;;  %v462_v31 = vpop.permute.xlu0 %461  ;;  %v534_v32 = vpop.permute.xlu1 %533  ;;  %v405_v38 = vmul.f32 %v402_v33, %v1541_v20 }
  0xba   : > { %v463_v34 = vrot.slane %v462_v31, 4  ;;  %414 = vrot.lane.b32.xlu0 %v406_v29, %s1343_s25  ;;  %v537_v37 = vrot.slane %v534_v32, 4  ;;  %v498_v43 = vcombine.low %v494_v35, %v494_v35 }
  0xbb   : > { %501 = vrot.lane.b32.xlu1 %v493_v30, %s1344_s27  ;;  %v497_v52 = vcombine.low %v493_v30, %v493_v30  ;;  %v409_v55 = vcombine.high %v405_v38, %v405_v38 }
  0xbc   : > { %v469_v36 = vmul.f32 %v463_v34, %v1539_v19  ;;  %v465_v41 = vsel %vm464_vm2, %v463_v34, %v462_v31 }
  0xbd   : > { %v536_v39 = vpop.permute.xlu0 %535  ;;  %v517_v40 = vpop.permute.xlu1 %516  ;;  %v468_v46 = vmul.f32 %v465_v41, %v1541_v20 }
  0xbe   : > { %477 = vrot.lane.b32.xlu0 %v469_v36, %s1345_s26  ;;  %v538_v42 = vrot.slane %v536_v39, 4  ;;  %v520_v45 = vrot.slane %v517_v40, 4 }
  0xbf   : > { %410 = vrot.lane.b32.xlu1 %v405_v38, %s1343_s25  ;;  %v472_v61 = vcombine.high %v468_v46, %v468_v46 }
  0xc0   : > { %v539_v44 = vsel %vm522_vm3, %v537_v37, %v538_v42 }
  0xc1   : > { %v519_v47 = vpop.permute.xlu0 %518  ;;  %v540_v48 = vsel %vm464_vm2, %v539_v44, %v536_v39  ;;  %v430_v51 = vpop.permute.xlu1 %429 }
  0xc2   : > { %503 = vrot.lane.b32.xlu0 %v498_v43, %s1344_s27  ;;  %v521_v49 = vrot.slane %v519_v47, 4  ;;  %v543_v50 = vmul.f32 %v540_v48, %v1529_v17 }
  0xc3   : > { %473 = vrot.lane.b32.xlu1 %v468_v46, %s1345_s26 }
  0xc4   : > { %v545_v53 = vcombine.high %v543_v50, %v543_v50  ;;  %547 = vst [vmem:[#allocation4 + $0x30] sm:$0xf] %v543_v50  ;;  %v523_v54 = vsel %vm522_vm3, %v520_v45, %v521_v49  ;;  %v577_v45 = vld [vmem:[%s1777_s2] sm:$0xff] }
  0xc5   : > { %v432_v56 = vpop.permute.xlu0 %431  ;;  %v524_v57 = vsel %vm489_vm0, %v523_v54, %v519_v47  ;;  %v563_v63 = vpop.permute.xlu1 %562 }
  0xc6   : > { %499 = vrot.lane.b32.xlu0 %v497_v52, %s1344_s27  ;;  %548 = vst [vmem:[#allocation4 + $0x38] sm:$0xf] %v545_v53  ;;  %v527_v58 = vmul.f32 %v524_v57, %v1537_v18  ;;  %v435_v59 = vsel %vm433_vm4, %v430_v51, %v432_v56  ;;  %v566_v2 = vrot.slane %v563_v63, 4 }
  0xc7   : > { %412 = vrot.lane.b32.xlu1 %v409_v55, %s1343_s25  ;;  %439 = vst [vmem:[#allocation4 + $0x8] sm:$0xf0] %v435_v59 }
  0xc8   : > { %v529_v60 = vcombine.low %v527_v58, %v527_v58  ;;  %532 = vst [vmem:[#allocation4 + $0x28] sm:$0xf0] %v527_v58 }
  0xc9   : > { %v428_v62 = vpop.permute.xlu0 %427 }
  0xca   : > { %553 = vrot.lane.b32.xlu0 %v1539_v19, %s1790_s29  ;;  %531 = vst [vmem:[#allocation4 + $0x20] sm:$0xf0] %v529_v60  ;;  %v434_v0 = vsel %vm433_vm4, %v428_v62, %v430_v51 }
  0xcb   : > { %475 = vrot.lane.b32.xlu1 %v472_v61, %s1345_s26  ;;  %438 = vst [vmem:[#allocation4] sm:$0xf0] %v434_v0 }
  0xcd   : > { %v565_v3 = vpop.permute.xlu0 %564 }
  0xce   : > { %v567_v4 = vrot.slane %v565_v3, 4  ;;  %672 = vperm.xlu0 %1199, %v669_v9  }
  0xcf   : > { %551 = vrot.lane.b32.xlu1 %v1556_v21, %s1790_s29  ;;  %v583_v38 = vld [vmem:[#allocation4 + $0x28] sm:$0xff] }
  0xd0   : > { %v568_v5 = vsel %vm522_vm3, %v566_v2, %v567_v4 }
  0xd1   : > { %v569_v6 = vsel %vm401_vm1, %v568_v5, %v565_v3  ;;  %v582_v41 = vld [vmem:[#allocation4 + $0x20] sm:$0xff] }
  0xd2   : > { %v571_v7 = vmul.f32 %v569_v6, %v1537_v18  ;;  %701 = vrot.lane.b32.xlu0 %v1521_v14, %s1788_s16 }
  0xd3   : > { %549 = vrot.lane.b32.xlu1 %v1541_v20, %s1790_s29  ;;  %s368_s29 = scalar_lea.vmem %s1776_s1, %s1117_s23  ;;  %s1118_s23 = sshll.u32 %s1420_s13, 8 }
  0xd4   : > { %v573_v8 = vcombine.high %v571_v7, %v571_v7  ;;  %575 = vst [vmem:[#allocation4 + $0x40] sm:$0xf] %v571_v7  ;;  %v689_v62 = vld [vmem:[%s368_s29] sm:$0xff]  ;;  %v690_v2 = vld [vmem:[%s368_s29 + $0x8] sm:$0xff]  ;;  %s1348_s13 = smov [#allocation9]  }
  0xd6   : > { %576 = vst [vmem:[#allocation4 + $0x48] sm:$0xf] %v573_v8  ;;  %742 = vrot.lane.b32.xlu0 %v1525_v16, %s1341_s17 }
  0xd7   : > { %680 = vperm.xlu1 %1200, %v677_v10  }
  0xda   : > { %768 = vrot.lane.b32.xlu0 %v1521_v14, %s1339_s20 }
  0xdb   : > { %699 = vrot.lane.b32.xlu1 %v1519_v13, %s1788_s16  ;;  %v586_v46 = vld [vmem:[#allocation4 + $0x40] sm:$0xf]  ;;  %s1800_s16 = smov 112  }
  0xdd   : > { %v587_v44 = vld [vmem:[#allocation4 + $0x48] sm:$0xf] }
  0xde   : > { %796 = vrot.lane.b32.xlu0 %v1525_v16, %s1344_s27 }
  0xdf   : > { %740 = vrot.lane.b32.xlu1 %v1523_v15, %s1341_s17 }
  0xe2   : > { %822 = vrot.lane.b32.xlu0 %v1521_v14, %s1345_s26 }
  0xe3   : > { %766 = vrot.lane.b32.xlu1 %v1519_v13, %s1339_s20 }
  0xe6   : > { %861 = vrot.lane.b32.xlu0 %v1525_v16, %s1343_s25 }
  0xe7   : > { %794 = vrot.lane.b32.xlu1 %v1523_v15, %s1344_s27 }
  0xea   : > { %728 = vrot.lane.b32.xlu0 %v1338_v1, %s1799_s19 }
  0xeb   : > { %820 = vrot.lane.b32.xlu1 %v1519_v13, %s1345_s26 }
  0xef   : > { %859 = vrot.lane.b32.xlu1 %v1523_v15, %s1343_s25 }
 0x12c   : > { %v415_v12 = vpop.permute.xlu0 %414 }
 0x12d   : > { %v502_v17 = vpop.permute.xlu1 %501 }
 0x130   : > { %v478_v18 = vpop.permute.xlu0 %477 }
 0x131   : > { %v411_v19 = vpop.permute.xlu1 %410 }
 0x134   : > { %v504_v20 = vpop.permute.xlu0 %503 }
 0x135   : > { %v507_v14 = vsel %vm505_vm5, %v502_v17, %v504_v20  ;;  %v474_v21 = vpop.permute.xlu1 %473 }
 0x136   : > { %511 = vst [vmem:[#allocation4 + $0x18] sm:$0xf0] %v507_v14 }
 0x138   : > { %v500_v13 = vpop.permute.xlu0 %499 }
 0x139   : > { %v506_v16 = vsel %vm505_vm5, %v500_v13, %v502_v17  ;;  %v413_v22 = vpop.permute.xlu1 %412 }
 0x13a   : > { %510 = vst [vmem:[#allocation4 + $0x10] sm:$0xf0] %v506_v16  ;;  %v417_v15 = vsel %vm416_vm6, %v411_v19, %v413_v22  ;;  %v418_v23 = vsel %vm416_vm6, %v413_v22, %v415_v12 }
 0x13b   : > { %421 = vst [vmem:[#allocation4] sm:$0xf] %v417_v15  ;;  %422 = vst [vmem:[#allocation4 + $0x8] sm:$0xf] %v418_v23 }
 0x13c   : > { %v554_v27 = vpop.permute.xlu0 %553 }
 0x13d   : > { %v476_v24 = vpop.permute.xlu1 %475 }
 0x13e   : > { %v480_v25 = vsel %vm479_vm7, %v474_v21, %v476_v24  ;;  %v481_v26 = vsel %vm479_vm7, %v476_v24, %v478_v18 }
 0x13f   : > { %484 = vst [vmem:[#allocation4 + $0x10] sm:$0xf] %v480_v25  ;;  %485 = vst [vmem:[#allocation4 + $0x18] sm:$0xf] %v481_v26 }
 0x141   : > { %v552_v28 = vpop.permute.xlu1 %551 }
 0x142   : > { %v557_v29 = vsel %vm555_vm8, %v552_v28, %v554_v27  ;;  %v579_v31 = vld [vmem:[#allocation4 + $0x8] sm:$0xff]  ;;  %v578_v34 = vld [vmem:[#allocation4] sm:$0xff] }
 0x143   : > { %561 = vst [vmem:[#allocation4 + $0x38] sm:$0xf0] %v557_v29 }
 0x145   : > { %v550_v30 = vpop.permute.xlu1 %549 }
 0x146   : > { %v556_v32 = vsel %vm555_vm8, %v550_v30, %v552_v28  ;;  %v581_v33 = vld [vmem:[#allocation4 + $0x18] sm:$0xff]  ;;  %v580_v35 = vld [vmem:[#allocation4 + $0x10] sm:$0xff] }
 0x147   : > { %560 = vst [vmem:[#allocation4 + $0x30] sm:$0xf0] %v556_v32  ;;  %v1119_v36 = vpack.c.bf16 %v581_v33, %v579_v31  ;;  %v1121_v37 = vpack.c.bf16 %v580_v35, %v578_v34 }
 0x149   : > { %1120 = vmatprep.subr.bf16.mxu0 %v1119_v36 }
 0x14a   : > { %1122 = vmatpush1.bf16.msra.mxu0 %v1121_v37  ;;  %v585_v39 = vld [vmem:[#allocation4 + $0x38] sm:$0xff] }
 0x14b   : > { %v1123_v40 = vpack.c.bf16 %v585_v39, %v583_v38  ;;  %v979_v39 = vld [vmem:[%s1781_s6] sm:$0xff] }
 0x14d   : > { %1124 = vmatprep.subr.bf16.mxu0 %v1123_v40  ;;  %v673_v54 = vpop.permute.xlu0 %672 }
 0x14e   : > { %v584_v42 = vld [vmem:[#allocation4 + $0x30] sm:$0xff] }
 0x14f   : > { %v1125_v43 = vpack.c.bf16 %v584_v42, %v582_v41  ;;  %v987_v41 = vld [vmem:[%s1782_s7] sm:$0xff] }
 0x151   : > { %1126 = vmatpush1.bf16.msra.mxu0 %v1125_v43  ;;  %v702_v55 = vpop.permute.xlu0 %701 }
 0x152   : > { %1107 = vmatprep.subr.msk.mxu0 %vm522_vm3, %v587_v44 }
 0x155   : > { %1108 = vmatpush1.msk.msra.mxu0 %vm522_vm3, %v586_v46  ;;  %v743_v56 = vpop.permute.xlu0 %742 }
 0x156   : > { %1109 = vmatmul.mubr.msk.f32.vlgmr.msra.gmra.mrb[0].mxu0 %vm588_vm9, %v577_v45  ;;  %v681_v47 = vpop.permute.xlu1 %680 }
 0x159   : > { %v769_v3 = vpop.permute.xlu0 %768 }
 0x15a   : > { %v700_v48 = vpop.permute.xlu1 %699 }
 0x15b   : > { %v707_v49 = vmul.f32 0.0, %v700_v48  ;;  %v703_v7 = vsel %vm401_vm1, %v700_v48, %v702_v55 }
 0x15d   : > { %713 = vrot.lane.b32.xlu1 %v707_v49, %s1343_s25  ;;  %v797_v13 = vpop.permute.xlu0 %796 }
 0x15e   : > { %v741_v50 = vpop.permute.xlu1 %740  ;;  %v804_v25 = vmul.f32 0.0, %v797_v13 }
 0x15f   : > { %v748_v51 = vmul.f32 0.0, %v741_v50  ;;  %v744_v9 = vsel %vm464_vm2, %v741_v50, %v743_v56 }
 0x161   : > { %754 = vrot.lane.b32.xlu1 %v748_v51, %s1345_s26  ;;  %v823_v27 = vpop.permute.xlu0 %822 }
 0x162   : > { %v767_v52 = vpop.permute.xlu1 %766  ;;  %v830_v32 = vmul.f32 0.0, %v823_v27 }
 0x163   : > { %v774_v53 = vmul.f32 0.0, %v767_v52  ;;  %v770_v5 = vsel %vm489_vm0, %v767_v52, %v769_v3 }
 0x165   : > { %780 = vrot.lane.b32.xlu0 %v774_v53, %s1344_s27  ;;  %v862_v35 = vpop.permute.xlu0 %861 }
 0x166   : > { %v795_v21 = vpop.permute.xlu1 %794  ;;  %v869_v37 = vmul.f32 0.0, %v862_v35 }
 0x167   : > { %v798_v15 = vsel %vm505_vm5, %v795_v21, %v797_v13 }
 0x169   : > { %v729_v42 = vpop.permute.xlu0 %728 }
 0x16a   : > { %v821_v24 = vpop.permute.xlu1 %820 }
 0x16b   : > { %v824_v29 = vsel %vm479_vm7, %v821_v24, %v823_v27 }
 0x16e   : > { %v860_v34 = vpop.permute.xlu1 %859 }
 0x16f   : > { %v863_v38 = vsel %vm416_vm6, %v860_v34, %v862_v35 }
 0x1cf   : > { %v714_v43 = vpop.permute.xlu1 %713 }
 0x1d3   : > { %v755_v45 = vpop.permute.xlu1 %754 }
 0x1d7   : > { %v781_v44 = vpop.permute.xlu0 %780 }
 0x229   : > { %v664_v57 = vpop.f32.mrb[0].mxu0 }
 0x22a   : > { %v675_v58 = vmul.f32 %v673_v54, %v664_v57  ;;  %v666_v59 = vpop.f32.mrb[1].mxu0 }
 0x22b   : > { %v676_v60 = vmul.f32 %v673_v54, %v666_v59 }
 0x22c   : > { %v683_v61 = vadd.f32 %v681_v47, %v675_v58 }
 0x22d   : > { %v684_v63 = vadd.f32 %v681_v47, %v676_v60 }
 0x22e   : > { %v685_v0 = vmax.f32 %v683_v61, 0.0 }
 0x22f   : > { %v686_v4 = vmax.f32 %v684_v63, 0.0 }
 0x230   : > { %v1660_v6 = vadd.f32 %v689_v62, %v685_v0 }
 0x231   : > { %v1663_v8 = vadd.f32 %v690_v2, %v686_v4 }
 0x232   : > { %v708_v10 = vmul.f32 %v703_v7, %v1660_v6  ;;  %v775_v17 = vmul.f32 %v770_v5, %v1660_v6  ;;  %v749_v20 = vmul.f32 %v744_v9, %v1660_v6  ;;  %v802_v23 = vmul.f32 %v795_v21, %v1660_v6 }
 0x233   : > { %v1201_v11 = vpack.i.bf16 %v1663_v8, %v1660_v6  ;;  %v709_v12 = vmul.f32 %v702_v55, %v1663_v8  ;;  %v776_v18 = vmul.f32 %v769_v3, %v1663_v8  ;;  %v750_v14 = vmul.f32 %v743_v56, %v1663_v8 }
 0x234   : > { %v828_v26 = vmul.f32 %v821_v24, %v1660_v6  ;;  %v803_v28 = vmul.f32 %v798_v15, %v1663_v8  ;;  %v1221_v30 = vpack.i.bf16 %v1338_v1, %v1663_v8  ;;  %v829_v31 = vmul.f32 %v824_v29, %v1663_v8 }
 0x235   : > { %1202 = vrot.lane.b32.xlu0 %v1201_v11, %s1799_s19  ;;  %v1206_v19 = vpack.i.bf16 %v709_v12, %v708_v10  ;;  %v1216_v16 = vpack.i.bf16 %v776_v18, %v775_v17  ;;  %v1211_v22 = vpack.i.bf16 %v750_v14, %v749_v20  ;;  %v868_v1 = vmul.f32 %v863_v38, %v1663_v8 }
 0x236   : > { %v1226_v33 = vpack.i.bf16 %v804_v25, %v803_v28  ;;  %v1231_v36 = vpack.i.bf16 %v830_v32, %v829_v31  ;;  %v867_v40 = vmul.f32 %v860_v34, %v1660_v6  ;;  %v885_v34 = vld [vmem:[%s1780_s5] sm:$0xff] }
 0x237   : > { %1207 = vrot.lane.b32.xlu1 %v1206_v19, %s1343_s25  ;;  %s1801_s25 = smov 111  }
 0x239   : > { %1217 = vrot.lane.b32.xlu0 %v1216_v16, %s1344_s27 }
 0x23b   : > { %1212 = vrot.lane.b32.xlu1 %v1211_v22, %s1345_s26  ;;  %s1731_s26 = scalar_lea.hbm %s1784_s9, %s1118_s23 }
 0x23d   : > { %808 = vrot.lane.b32.xlu0 %v802_v23, %s1339_s20 }
 0x23f   : > { %834 = vrot.lane.b32.xlu1 %v828_v26, %s1341_s17 }
 0x241   : > { %1222 = vrot.lane.b32.xlu0 %v1221_v30, %s1800_s16 }
 0x243   : > { %1227 = vrot.lane.b32.xlu1 %v1226_v33, %s1339_s20  ;;  %s1000_s20 = scalar_lea.sflag [#allocation8], %s1504_s24 }
 0x245   : > { %847 = vrot.lane.b32.xlu0 %v1660_v6, %s1800_s16  ;;  %s1014_s16 = sshll.u32 %s363_s28, 4  ;;  %s1733_s16 = int_to_ptr.vmem [resolvable:$true] %s1014_s16 }
 0x246   : > { %s1269_s29 = scalar_lea.vmem %s1733_s16, 256 }
 0x247   : > { %1232 = vrot.lane.b32.xlu1 %v1231_v36, %s1341_s17  ;;  %p1270_p11 = scmp.ne.s32.totalorder %s1733_s16, %s1269_s29  ;;  %s1273_s17 = sshll.u32 %s1348_s13, 4  ;;  %s1274_s17 = int_to_ptr.vmem [resolvable:$false] %s1273_s17 }
 0x248   : > { %s1275_s19 = scalar_lea.vmem %s1274_s17, 512  ;;  %p1276_p10 = scmp.lt.s32.totalorder %s1733_s16, %s1274_s17 }
 0x249   : > { %877 = vrot.lane.b32.xlu0 %v869_v37, %s1801_s25  ;;  %p1271_p13 = pnand %p1270_p11, %p1802_p12  ;;  %p1277_p2 = scmp.lt.s32.totalorder %s1275_s19, %s1269_s29 }
 0x24b   : > { %875 = vrot.lane.b32.xlu1 %v868_v1, %s1801_s25  ;;  %p1272_p7 = pneg %p1271_p13  ;;  %p1278_p4 = por %p1277_p2, %p1276_p10 }
 0x24d   : > { %982 = vperm.xlu0 %1199, %v979_v39   ;;  %p1279_p5 = pnand %p1278_p4, %p1272_p7 }
 0x24f   : > { %873 = vrot.lane.b32.xlu1 %v867_v40, %s1801_s25 }
 0x253   : > { %990 = vperm.xlu1 %1200, %v987_v41  }
 0x2a7   : > { %v1203_v46 = vpop.permute.xlu0 %1202 }
 0x2a8   : > { %v1205_v47 = vunpack.i.h.bf16 %v1203_v46  ;;  %v1204_v48 = vunpack.i.l.bf16 %v1203_v46 }
 0x2a9   : > { %v1208_v49 = vpop.permute.xlu1 %1207 }
 0x2aa   : > { %v1210_v50 = vunpack.i.h.bf16 %v1208_v49  ;;  %v1209_v51 = vunpack.i.l.bf16 %v1208_v49  ;;  %v735_v53 = vsel %vm433_vm4, %v1204_v48, %v1205_v47  ;;  %v734_v54 = vsel %vm433_vm4, %v729_v42, %v1204_v48 }
 0x2ab   : > { %v1218_v52 = vpop.permute.xlu0 %1217 }
 0x2ac   : > { %v1220_v55 = vunpack.i.h.bf16 %v1218_v52  ;;  %v1219_v56 = vunpack.i.l.bf16 %v1218_v52  ;;  %v720_v57 = vsel %vm416_vm6, %v1209_v51, %v1210_v50  ;;  %v719_v58 = vsel %vm416_vm6, %v714_v43, %v1209_v51 }
 0x2ad   : > { %v1213_v59 = vpop.permute.xlu1 %1212  ;;  %v1127_v60 = vpack.c.bf16 %v735_v53, %v720_v57  ;;  %v1129_v61 = vpack.c.bf16 %v734_v54, %v719_v58 }
 0x2ae   : > { %v1215_v62 = vunpack.i.h.bf16 %v1213_v59  ;;  %v1214_v63 = vunpack.i.l.bf16 %v1213_v59  ;;  %v787_v3 = vsel %vm505_vm5, %v1219_v56, %v1220_v55  ;;  %v786_v5 = vsel %vm505_vm5, %v781_v44, %v1219_v56 }
 0x2af   : > { %v809_v0 = vpop.permute.xlu0 %808  ;;  %1128 = vmatprep.subr.bf16.mxu1 %v1127_v60 }
 0x2b0   : > { %1130 = vmatpush1.bf16.msra.mxu1 %v1129_v61  ;;  %v761_v2 = vsel %vm479_vm7, %v1214_v63, %v1215_v62  ;;  %v760_v4 = vsel %vm479_vm7, %v755_v45, %v1214_v63 }
 0x2b1   : > { %v835_v7 = vpop.permute.xlu1 %834  ;;  %v1131_v9 = vpack.c.bf16 %v787_v3, %v761_v2  ;;  %v1133_v10 = vpack.c.bf16 %v786_v5, %v760_v4 }
 0x2b3   : > { %v1223_v11 = vpop.permute.xlu0 %1222  ;;  %1132 = vmatprep.subr.bf16.mxu1 %v1131_v9 }
 0x2b4   : > { %1134 = vmatpush1.bf16.msra.mxu1 %v1133_v10  ;;  %v1225_v19 = vunpack.i.h.bf16 %v1223_v11  ;;  %v1224_v20 = vunpack.i.l.bf16 %v1223_v11 }
 0x2b5   : > { %v1228_v12 = vpop.permute.xlu1 %1227 }
 0x2b6   : > { %v1230_v17 = vunpack.i.h.bf16 %v1228_v12  ;;  %v1229_v18 = vunpack.i.l.bf16 %v1228_v12  ;;  %v854_v27 = vsel %vm555_vm8, %v1224_v20, %v1225_v19 }
 0x2b7   : > { %v848_v13 = vpop.permute.xlu0 %847 }
 0x2b8   : > { %v815_v14 = vsel %vm489_vm0, %v1229_v18, %v1230_v17  ;;  %v814_v21 = vsel %vm489_vm0, %v809_v0, %v1229_v18  ;;  %v853_v25 = vsel %vm555_vm8, %v848_v13, %v1224_v20 }
 0x2b9   : > { %v1233_v16 = vpop.permute.xlu1 %1232  ;;  %v1135_v22 = vpack.c.bf16 %v815_v14, %v1663_v8  ;;  %v1137_v15 = vpack.c.bf16 %v814_v21, %v1660_v6 }
 0x2ba   : > { %v1235_v23 = vunpack.i.h.bf16 %v1233_v16  ;;  %v1234_v24 = vunpack.i.l.bf16 %v1233_v16 }
 0x2bb   : > { %1136 = vmatprep.subr.bf16.mxu1 %v1135_v22  ;;  %v878_v30 = vpop.permute.xlu0 %877 }
 0x2bc   : > { %1138 = vmatpush1.bf16.msra.mxu1 %v1137_v15  ;;  %v841_v26 = vsel %vm464_vm2, %v1234_v24, %v1235_v23  ;;  %v840_v28 = vsel %vm464_vm2, %v835_v7, %v1234_v24 }
 0x2bd   : > { %v876_v29 = vpop.permute.xlu1 %875  ;;  %v1139_v31 = vpack.c.bf16 %v854_v27, %v841_v26  ;;  %v1141_v32 = vpack.c.bf16 %v853_v25, %v840_v28 }
 0x2be   : > { %v880_v6 = vsel %vm401_vm1, %v876_v29, %v878_v30 }
 0x2bf   : > { %1140 = vmatprep.subr.bf16.mxu1 %v1139_v31 }
 0x2c0   : > { %1142 = vmatpush1.bf16.msra.mxu1 %v1141_v32 }
 0x2c1   : > { %v874_v8 = vpop.permute.xlu1 %873  ;;  %924 = vmatprep.subr.mxu1 %v880_v6 }
 0x2c2   : > { %v879_v33 = vsel %vm401_vm1, %v874_v8, %v876_v29 }
 0x2c4   : > { %925 = vmatpush1.msra.mxu1 %v879_v33 }
 0x2c5   : > { %1110 = vmatmul.mubr.msk.f32.vlgmr.msra.gmra.mrb[0].mxu1 %vm904_vm10, %v885_v34 }
 0x2cc   : > { %v983_v35 = vpop.permute.xlu0 %982 }
 0x2d2   : > { %v991_v1 = vpop.permute.xlu1 %990 }
 0x398   : > { %v974_v36 = vpop.f32.mrb[0].mxu1 }
 0x399   : > { %v985_v37 = vmul.f32 %v983_v35, %v974_v36  ;;  %v976_v38 = vpop.f32.mrb[1].mxu1 }
 0x39a   : > { %v986_v39 = vmul.f32 %v983_v35, %v976_v38 }
 0x39b   : > { %v993_v40 = vadd.f32 %v991_v1, %v985_v37 }
 0x39c   : > { %v994_v41 = vadd.f32 %v991_v1, %v986_v39 }
 0x39d   : > { %v995_v42 = vmax.f32 %v993_v40, 0.0 }
 0x39e   : > { %v996_v43 = vmax.f32 %v994_v41, 0.0 }
 0x39f   : > { %997 = vst [vmem:[%s363_s28] sm:$0xff] %v995_v42 }
 0x3a0   : > { %998 = vst [vmem:[%s363_s28 + $0x8] sm:$0xff] %v996_v43 }
 0x3a1   : > { %1282 = shalt.err (!%p1279_p5)
}
 0x3a2   : > { %s1283_s24 = scalar_lea.hbm %s1731_s26, 256  ;;  %s1287_s28 = scalar_lea.hbm %s1784_s9, 512 }
 0x3a3   : > { %p1284_p8 = scmp.ne.s32.totalorder %s1731_s26, %s1283_s24  ;;  %p1288_p1 = scmp.lt.u32.totalorder %s1731_s26, %s1784_s9 }
 0x3a4   : > { %p1289_p3 = scmp.lt.u32.totalorder %s1287_s28, %s1283_s24  ;;  %p1291_p11 = scmp.lt.u32.totalorder %s1283_s24, %s1731_s26 }
 0x3a5   : > { %p1285_p9 = pnand %p1284_p8, %p1802_p12 }
 0x3a6   : > { %p1290_p6 = por %p1289_p3, %p1288_p1 }
 0x3a7   : > { %p1286_p0 = pneg %p1285_p9 }
 0x3a8   : > { %p1292_p13 = por %p1291_p11, %p1290_p6 }
 0x3aa   : > { %p1293_p7 = pnand %p1292_p13, %p1286_p0 }
 0x3ac   : > { %1296 = shalt.err (!%p1293_p7)
}
 0x3ad   : > { %1145 = dma.vmem_to_hbm [thread:$0]  (%p1802_p12), %s1733_s16, 256, %s1731_s26, %s1000_s20  }
 0x3ae PF: > { %s1026_s29 = sand.u32 1, %s1323_s30   ;;  %p1803_p10 = scmp.ne.s32.totalorder %s1795_s22, 0 }
 0x3af   : > { %p1804_p2 = scmp.ge.s32.totalorder %s1335_s12, 2  ;;  %s1027_s13 = scalar_lea.sflag [#allocation8], %s1026_s29 }
 0x3b1   : > { %p1152_p4 = pnand %p1804_p2, %p1803_p10 }
 0x3b3   : > { %1318 = dma.done.wait (!%p1152_p4), %s1027_s13, 256  }
 0x3b4   : > { %1320 = vsyncadd (!%p1152_p4), %s1027_s13, 4294967040  ;;  %p22_p5 = scmp.ge.s32.totalorder %s1424_s15, 4   ;;  %s1805_s30 = smov %s1327_s10 }
 0x3b5   : > { %s1806_s10 = smov %s1331_s11  ;;  %s1807_s11 = smov %s1436_s18 }
 0x3b6   : > { %s1808_s12 = smov %s1424_s15  ;;  %24 = sbr.rel (!%p22_p5) target bundleno = 5 (0x5), region = 104 }
 0x3bd   :  { %1032 = vsyncpa [#allocation7], 1 }
 0x3be   :  { %1034 = vsyncpa [#allocation7 + $0x1], 1 }
 0x3bf   :  { %1035 = vsyncpa [#allocation8], 1 }
 0x3c0   :  { %1037 = vsyncpa [#allocation8 + $0x1], 1 }

</bundles_post_ra>
